<compile_context>
chip_gen: v7x
topology: tpu7x:2x2x1
jax: 0.10.0
libtpu: 0.0.40
codegen_flags: <defaults>
</compile_context>

<pallas_src>
import functools
import math

import jax
import jax.numpy as jnp
import numpy as np
from jax.experimental import pallas as pl
from jax.experimental.pallas import tpu as pltpu


# ------------------------------ Pallas kernel ------------------------------

def _tail_kernel(t1_ref, wwt_ref, wd_ref, be_ref, x_ref, o_ref, up_ref):
    # t1_ref : (1, rows*C, ws)  height-interpolated, w4-folded low-res slab (f32)
    #                           row order is (image_row, channel) row-major.
    # wwt_ref: (ws, W)          width bilinear weights, transposed (resident)
    # wd_ref : (C, C)           folded direct path (w1 wf w4)^T    (resident)
    # be_ref : (C, 1)           folded bias                         (resident)
    # x_ref  : (1, C, rows*W)   lane-dense bf16 input slab
    # o_ref  : (1, C, rows*W)   gated f32 output slab
    # up_ref : (C, rows*W)      VMEM scratch for the upsampled map
    C = wd_ref.shape[0]
    W = wwt_ref.shape[1]
    rows = up_ref.shape[1] // W

    # All elementwise / accumulate math in f32 (v5e VPU/EUP have no bf16).
    xf = x_ref[0].astype(jnp.float32)                                  # (C, T)
    direct = jnp.dot(wd_ref[...], xf, preferred_element_type=jnp.float32)

    # Width pass of the separable bilinear upsample: one small 2D matmul.
    up2d = jnp.dot(t1_ref[0], wwt_ref[...],
                   preferred_element_type=jnp.float32)                 # (rows*C, W)

    # Re-arrange (row, channel)-major rows into the lane-dense (C, rows*W)
    # layout with static slice copies only (no reshape/transpose lowering risk).
    for i in range(rows):
        up_ref[:, i * W:(i + 1) * W] = up2d[i * C:(i + 1) * C, :]

    c4 = direct + up_ref[...] + be_ref[...]

    # Stable sigmoid: e = exp(-|c4|) in (0,1], denominator in [1,2] so the
    # approximate EUP reciprocal is safe for any c4.
    e = jnp.exp(-jnp.abs(c4))
    r = pl.reciprocal(1.0 + e, approx=True)
    m = jnp.where(c4 >= 0.0, r, e * r)

    o_ref[0] = xf * m
    # Note: with a bf16 output this could use input_output_aliases={4: 0} to
    # reuse the x3 buffer; kept f32 output here for accuracy vs the reference.


def _pick_rows(H, W, C):
    """Image rows per grid step (lane tile = rows*W), VMEM-budget derived."""
    g = math.gcd(8 * W, 128)
    base = 8 * (128 // g)      # smallest rows with rows%8==0 and (rows*W)%128==0
    if base >= H:
        return H               # tiny image: one full-extent block per batch
    # bf16 in + f32 out double buffered, plus ~4 f32 temps per element.
    budget = (12 * 2 ** 20) // (C * W * (2 * (2 + 4) + 4 * 4))
    # Prefer ~2-4k lane tiles but keep >= 4 spatial steps (pipelining / 2 TCs).
    target = max(1, min(4096 // max(W, 1), H // 4))
    rows = max(base, min(budget, target, 64) // base * base)
    return rows


def pallas_esa_tail(T1, WwT, WdT, b_eff, x3, H, W, rows):
    """Fused separable-upsample + folded conv_f/conv4 + sigmoid + gating."""
    B, C, HW = x3.shape
    ws = WwT.shape[0]
    T = rows * W
    n_tiles = pl.cdiv(H, rows)         # padded grid; boundary blocks are masked
    return pl.pallas_call(
        _tail_kernel,
        out_shape=jax.ShapeDtypeStruct((B, C, HW), jnp.float32),
        grid=(B, n_tiles),
        in_specs=[
            pl.BlockSpec((1, rows * C, ws), lambda b, i: (b, i, 0)),
            pl.BlockSpec((ws, W), lambda b, i: (0, 0)),
            pl.BlockSpec((C, C), lambda b, i: (0, 0)),
            pl.BlockSpec((C, 1), lambda b, i: (0, 0)),
            pl.BlockSpec((1, C, T), lambda b, i: (b, 0, i)),
        ],
        out_specs=pl.BlockSpec((1, C, T), lambda b, i: (b, 0, i)),
        scratch_shapes=[pltpu.VMEM((C, T), jnp.float32)],
        compiler_params=pltpu.CompilerParams(
            dimension_semantics=("parallel", "parallel")),
    )(T1, WwT, WdT, b_eff.reshape(C, 1), x3)


# ------------------------------- glue helpers ------------------------------

def _axis_weights_np(out_size, in_size):
    """1-D bilinear weights matching F.interpolate(align_corners=False)."""
    scale = in_size / out_size
    dst = np.arange(out_size, dtype=np.float64)
    src = np.maximum((dst + 0.5) * scale - 0.5, 0.0)
    i0 = np.minimum(np.floor(src).astype(np.int64), in_size - 1)
    i1 = np.minimum(i0 + 1, in_size - 1)
    lam1 = src - i0
    lam0 = 1.0 - lam1
    m = np.zeros((out_size, in_size), dtype=np.float64)
    m[np.arange(out_size), i0] += lam0
    m[np.arange(out_size), i1] += lam1
    return m


@functools.lru_cache(maxsize=None)
def _axis_weights(out_size, in_size):
    return jnp.asarray(_axis_weights_np(out_size, in_size), dtype=jnp.float32)


def _lowres_chain_xla(params, x_nchw):
    """conv2(s2, with conv1 folded in) -> MaxPool(7,3) -> conv+GELU x2 -> conv."""
    # TODO(synk): intentionally plain XLA, not Pallas - these tensors are tiny
    # (<= ~31x31x4) so pallas_call launch + im2col overhead would dominate.
    hp = jax.lax.Precision.HIGHEST

    def conv(z, w, b, stride):
        y = jax.lax.conv_general_dilated(
            z, w, (stride, stride), "VALID",
            dimension_numbers=("NCHW", "OIHW", "NCHW"), precision=hp)
        return y + b.reshape(1, -1, 1, 1)

    # Fold conv1 (Linear num_feat->f) into conv2 so the full-res conv1 output
    # (and its Pallas kernel + HBM round trip) is never materialized.
    w2f = jnp.einsum("omhw,im->oihw", params["w2"], params["w1"], precision=hp)
    b2f = params["b2"] + jnp.einsum("omhw,m->o", params["w2"], params["b1"],
                                    precision=hp)

    c1 = conv(x_nchw, w2f, b2f, 2)
    v_max = jax.lax.reduce_window(
        c1, jnp.array(-jnp.inf, jnp.float32), jax.lax.max,
        (1, 1, 7, 7), (1, 1, 3, 3), "VALID")
    v_range = jax.nn.gelu(conv(v_max, params["wmax"], params["bmax"], 1),
                          approximate=False)
    c3 = jax.nn.gelu(conv(v_range, params["w3"], params["b3"], 1),
                     approximate=False)
    return conv(c3, params["w3_"], params["b3_"], 1)          # (B, f, hs, ws)


# ------------------------------- ESA module --------------------------------

def init_esa_params(key, num_feat=16):
    f = num_feat // 4
    ks = jax.random.split(key, 14)

    def dense(k, fan_in, shape):
        return jax.random.normal(k, shape, jnp.float32) / math.sqrt(fan_in)

    # Linear weights stored already transposed: (in, out) so y = x @ w + b.
    return {
        "w1": dense(ks[0], num_feat, (num_feat, f)), "b1": dense(ks[1], num_feat, (f,)),
        "wf": dense(ks[2], f, (f, f)),               "bf": dense(ks[3], f, (f,)),
        "w2": dense(ks[4], f * 9, (f, f, 3, 3)),     "b2": dense(ks[5], f * 9, (f,)),
        "wmax": dense(ks[6], f * 9, (f, f, 3, 3)),   "bmax": dense(ks[7], f * 9, (f,)),
        "w3": dense(ks[8], f * 9, (f, f, 3, 3)),     "b3": dense(ks[9], f * 9, (f,)),
        "w3_": dense(ks[10], f * 9, (f, f, 3, 3)),   "b3_": dense(ks[11], f * 9, (f,)),
        "w4": dense(ks[12], f, (f, num_feat)),       "b4": dense(ks[13], f, (num_feat,)),
    }


def esa_forward(params, x_nchw):
    B, C, H, W = x_nchw.shape
    HW = H * W
    hp = jax.lax.Precision.HIGHEST

    # Channels-first lane-dense slab (no transpose from NCHW).  bf16 halves the
    # kernel's HBM read; in a full network the upstream layer would already
    # produce bf16 so this cast fuses away.
    x3 = x_nchw.reshape(B, C, HW).astype(jnp.bfloat16)

    # Low-res attention chain (plain XLA, conv1 folded into conv2).
    c3 = _lowres_chain_xla(params, x_nchw)                    # (B, f, hs, ws)
    hs, ws = int(c3.shape[2]), int(c3.shape[3])

    # Fold conv4 into the low-res map and run the HEIGHT pass of the separable
    # bilinear upsample in XLA (everything here is tiny; HIGHEST is free).
    A = jnp.einsum("fc,bfhw->bchw", params["w4"], c3, precision=hp)   # (B,C,hs,ws)
    Wh = _axis_weights(H, hs)                                         # (H, hs)
    T1 = jnp.einsum("ih,bchw->bicw", Wh, A, precision=hp)             # (B,H,C,ws)
    T1 = T1.reshape(B, H * C, ws)            # (row, channel)-major for the kernel
    WwT = jnp.transpose(_axis_weights(W, ws))                         # (ws, W)

    # Fold conv_f + conv4 direct path and the biases:
    #   c4 = up@w4 + x@(w1 wf w4) + [(b1 wf + bf) w4 + b4]
    WdT = jnp.dot(jnp.dot(params["w1"], params["wf"], precision=hp),
                  params["w4"], precision=hp).T                        # (C, C)
    b_eff = (jnp.dot(jnp.dot(params["b1"], params["wf"], precision=hp)
                     + params["bf"], params["w4"], precision=hp)
             + params["b4"])                                           # (C,)

    rows = _pick_rows(H, W, C)
    out3 = pallas_esa_tail(T1, WwT, WdT, b_eff, x3, H, W, rows)        # (B,C,HW)
    return out3.reshape(B, C, H, W)                                    # NCHW


# --------------------------- pure-JAX reference -----------------------------

def _bilinear_weight_matrix(out_size, in_size):
    """Independent jnp/one_hot align_corners=False matrix for the reference."""
    scale = in_size / out_size
    dst = jnp.arange(out_size, dtype=jnp.float32)
    src = jnp.maximum((dst + 0.5) * scale - 0.5, 0.0)
    i0 = jnp.minimum(jnp.floor(src).astype(jnp.int32), in_size - 1)
    i1 = jnp.minimum(i0 + 1, in_size - 1)
    lam1 = src - i0.astype(jnp.float32)
    lam0 = 1.0 - lam1
    oh0 = jax.nn.one_hot(i0, in_size, dtype=jnp.float32)
    oh1 = jax.nn.one_hot(i1, in_size, dtype=jnp.float32)
    return oh0 * lam0[:, None] + oh1 * lam1[:, None]             # (out, in)


def esa_reference(params, x_nchw):
    B, C, H, W = x_nchw.shape
    x = jnp.transpose(x_nchw, (0, 2, 3, 1)).astype(jnp.float32)

    def conv(z, w, b, stride):
        wj = jnp.transpose(w, (2, 3, 1, 0))                      # HWIO
        y = jax.lax.conv_general_dilated(
            z, wj, (stride, stride), "VALID",
            dimension_numbers=("NHWC", "HWIO", "NHWC"),
            precision=jax.lax.Precision.HIGHEST)
        return y + b

    c1_ = x @ params["w1"] + params["b1"]
    c1 = conv(c1_, params["w2"], params["b2"], 2)
    v_max = jax.lax.reduce_window(
        c1, jnp.array(-jnp.inf, jnp.float32), jax.lax.max,
        (1, 7, 7, 1), (1, 3, 3, 1), "VALID")
    v_range = jax.nn.gelu(conv(v_max, params["wmax"], params["bmax"], 1),
                          approximate=False)
    c3 = jax.nn.gelu(conv(v_range, params["w3"], params["b3"], 1),
                     approximate=False)
    c3 = conv(c3, params["w3_"], params["b3_"], 1)
    hs, ws = c3.shape[1], c3.shape[2]
    Wh = _bilinear_weight_matrix(H, hs)
    Ww = _bilinear_weight_matrix(W, ws)
    up = jnp.einsum("ih,jw,bhwc->bijc", Wh, Ww, c3,
                    precision=jax.lax.Precision.HIGHEST)
    cf = c1_ @ params["wf"] + params["bf"]
    c4 = (up + cf) @ params["w4"] + params["b4"]
    m = jax.nn.sigmoid(c4)
    return x_nchw * jnp.transpose(m, (0, 3, 1, 2))


# ----------------------------------- main -----------------------------------

if __name__ == "__main__":
    key = jax.random.PRNGKey(0)
    k_p, k_x = jax.random.split(key)

    num_feat = 16            # f = num_feat // 4 = 4
    B, H, W = 2, 64, 64      # spatial must be >= 51 for the no-pad conv chain

    params = init_esa_params(k_p, num_feat)
    x = jax.random.normal(k_x, (B, num_feat, H, W), jnp.float32)

    fwd = jax.jit(functools.partial(esa_forward, params))
    y = jax.block_until_ready(fwd(x))

    y_ref = esa_reference(params, x)
    err = jnp.max(jnp.abs(y - y_ref))
    assert y.shape == x.shape
    # Kernel path uses bf16 input I/O, DEFAULT (bf16-MXU) matmul precision and
    # an approximate EUP reciprocal for the gate, vs an f32/HIGHEST reference.
    assert jnp.isfinite(err) and err < 5e-2, f"max abs err {err}"
    print("KERNEL_OK")
</pallas_src>

<mosaic_0001>
module attributes {stable_mosaic.version = 11 : i64} {
  func.func @_tail_kernel(%arg0: i32, %arg1: i32, %arg2: memref<1x256x3xf32, #tpu.memory_space<vmem>>, %arg3: memref<3x64xf32, #tpu.memory_space<vmem>>, %arg4: memref<16x16xf32, #tpu.memory_space<vmem>>, %arg5: memref<16x1xf32, #tpu.memory_space<vmem>>, %arg6: memref<1x16x1024xbf16, #tpu.memory_space<vmem>>, %arg7: memref<1x16x1024xf32, #tpu.memory_space<vmem>>, %arg8: memref<16x1024xf32, #tpu.memory_space<vmem>>) attributes {dimension_semantics = [#tpu.dimension_semantics<parallel>, #tpu.dimension_semantics<parallel>], iteration_bounds = array<i64: 2, 4>, scalar_prefetch = 0 : i64, scratch_operands = 1 : i64, tpu.core_type = #tpu.core_type<tc>, window_params = [{transform_indices = @transform_0, window_bounds = array<i64: 1, 256, 3>}, {pipeline_mode = #tpu.pipeline_mode<synchronous>, transform_indices = @transform_1, window_bounds = array<i64: 3, 64>}, {pipeline_mode = #tpu.pipeline_mode<synchronous>, transform_indices = @transform_2, window_bounds = array<i64: 16, 16>}, {pipeline_mode = #tpu.pipeline_mode<synchronous>, transform_indices = @transform_3, window_bounds = array<i64: 16, 1>}, {transform_indices = @transform_4, window_bounds = array<i64: 1, 16, 1024>}, {transform_indices = @transform_5, window_bounds = array<i64: 1, 16, 1024>}]} {
    %c0 = arith.constant 0 : index
    %c0_0 = arith.constant 0 : index
    %c0_1 = arith.constant 0 : index
    %0 = vector.load %arg6[%c0, %c0_0, %c0_1] : memref<1x16x1024xbf16, #tpu.memory_space<vmem>>, vector<1x16x1024xbf16>
    %1 = vector.shape_cast %0 : vector<1x16x1024xbf16> to vector<16x1024xbf16>
    %2 = arith.extf %1 : vector<16x1024xbf16> to vector<16x1024xf32>
    %c0_2 = arith.constant 0 : index
    %c0_3 = arith.constant 0 : index
    %3 = vector.load %arg4[%c0_2, %c0_3] : memref<16x16xf32, #tpu.memory_space<vmem>>, vector<16x16xf32>
    %cst = arith.constant dense<0.000000e+00> : vector<16x1024xf32>
    %4 = tpu.matmul %3, %2, %cst {dimension_numbers = #tpu.dot_dimension_numbers<[1], [0], [0], [1], [0, 0, 1, 1], [], []>} : vector<16x16xf32>, vector<16x1024xf32>, vector<16x1024xf32> -> vector<16x1024xf32>
    %c0_4 = arith.constant 0 : index
    %c0_5 = arith.constant 0 : index
    %c0_6 = arith.constant 0 : index
    %5 = vector.load %arg2[%c0_4, %c0_5, %c0_6] : memref<1x256x3xf32, #tpu.memory_space<vmem>>, vector<1x256x3xf32>
    %6 = vector.shape_cast %5 : vector<1x256x3xf32> to vector<256x3xf32>
    %c0_7 = arith.constant 0 : index
    %c0_8 = arith.constant 0 : index
    %7 = vector.load %arg3[%c0_7, %c0_8] : memref<3x64xf32, #tpu.memory_space<vmem>>, vector<3x64xf32>
    %cst_9 = arith.constant dense<0.000000e+00> : vector<256x64xf32>
    %8 = tpu.matmul %6, %7, %cst_9 {dimension_numbers = #tpu.dot_dimension_numbers<[1], [0], [0], [1], [0, 0, 1, 1], [], []>} : vector<256x3xf32>, vector<3x64xf32>, vector<256x64xf32> -> vector<256x64xf32>
    %9 = vector.extract_strided_slice %8 {offsets = [0, 0], sizes = [16, 64], strides = [1, 1]} : vector<256x64xf32> to vector<16x64xf32>
    %c0_10 = arith.constant 0 : index
    %c0_11 = arith.constant 0 : index
    %10 = vector.load %arg8[%c0_10, %c0_11] : memref<16x1024xf32, #tpu.memory_space<vmem>>, vector<16x64xf32>
    tpu.vector_store %arg8[%c0_10, %c0_11], %9 {strides = array<i32>} : memref<16x1024xf32, #tpu.memory_space<vmem>>, vector<16x64xf32>,
    %11 = vector.extract_strided_slice %8 {offsets = [16, 0], sizes = [16, 64], strides = [1, 1]} : vector<256x64xf32> to vector<16x64xf32>
    %c0_12 = arith.constant 0 : index
    %c64 = arith.constant 64 : index
    %12 = vector.load %arg8[%c0_12, %c64] : memref<16x1024xf32, #tpu.memory_space<vmem>>, vector<16x64xf32>
    tpu.vector_store %arg8[%c0_12, %c64], %11 {strides = array<i32>} : memref<16x1024xf32, #tpu.memory_space<vmem>>, vector<16x64xf32>,
    %13 = vector.extract_strided_slice %8 {offsets = [32, 0], sizes = [16, 64], strides = [1, 1]} : vector<256x64xf32> to vector<16x64xf32>
    %c0_13 = arith.constant 0 : index
    %c128 = arith.constant 128 : index
    %14 = vector.load %arg8[%c0_13, %c128] : memref<16x1024xf32, #tpu.memory_space<vmem>>, vector<16x64xf32>
    tpu.vector_store %arg8[%c0_13, %c128], %13 {strides = array<i32>} : memref<16x1024xf32, #tpu.memory_space<vmem>>, vector<16x64xf32>,
    %15 = vector.extract_strided_slice %8 {offsets = [48, 0], sizes = [16, 64], strides = [1, 1]} : vector<256x64xf32> to vector<16x64xf32>
    %c0_14 = arith.constant 0 : index
    %c192 = arith.constant 192 : index
    %16 = vector.load %arg8[%c0_14, %c192] : memref<16x1024xf32, #tpu.memory_space<vmem>>, vector<16x64xf32>
    tpu.vector_store %arg8[%c0_14, %c192], %15 {strides = array<i32>} : memref<16x1024xf32, #tpu.memory_space<vmem>>, vector<16x64xf32>,
    %17 = vector.extract_strided_slice %8 {offsets = [64, 0], sizes = [16, 64], strides = [1, 1]} : vector<256x64xf32> to vector<16x64xf32>
    %c0_15 = arith.constant 0 : index
    %c256 = arith.constant 256 : index
    %18 = vector.load %arg8[%c0_15, %c256] : memref<16x1024xf32, #tpu.memory_space<vmem>>, vector<16x64xf32>
    tpu.vector_store %arg8[%c0_15, %c256], %17 {strides = array<i32>} : memref<16x1024xf32, #tpu.memory_space<vmem>>, vector<16x64xf32>,
    %19 = vector.extract_strided_slice %8 {offsets = [80, 0], sizes = [16, 64], strides = [1, 1]} : vector<256x64xf32> to vector<16x64xf32>
    %c0_16 = arith.constant 0 : index
    %c320 = arith.constant 320 : index
    %20 = vector.load %arg8[%c0_16, %c320] : memref<16x1024xf32, #tpu.memory_space<vmem>>, vector<16x64xf32>
    tpu.vector_store %arg8[%c0_16, %c320], %19 {strides = array<i32>} : memref<16x1024xf32, #tpu.memory_space<vmem>>, vector<16x64xf32>,
    %21 = vector.extract_strided_slice %8 {offsets = [96, 0], sizes = [16, 64], strides = [1, 1]} : vector<256x64xf32> to vector<16x64xf32>
    %c0_17 = arith.constant 0 : index
    %c384 = arith.constant 384 : index
    %22 = vector.load %arg8[%c0_17, %c384] : memref<16x1024xf32, #tpu.memory_space<vmem>>, vector<16x64xf32>
    tpu.vector_store %arg8[%c0_17, %c384], %21 {strides = array<i32>} : memref<16x1024xf32, #tpu.memory_space<vmem>>, vector<16x64xf32>,
    %23 = vector.extract_strided_slice %8 {offsets = [112, 0], sizes = [16, 64], strides = [1, 1]} : vector<256x64xf32> to vector<16x64xf32>
    %c0_18 = arith.constant 0 : index
    %c448 = arith.constant 448 : index
    %24 = vector.load %arg8[%c0_18, %c448] : memref<16x1024xf32, #tpu.memory_space<vmem>>, vector<16x64xf32>
    tpu.vector_store %arg8[%c0_18, %c448], %23 {strides = array<i32>} : memref<16x1024xf32, #tpu.memory_space<vmem>>, vector<16x64xf32>,
    %25 = vector.extract_strided_slice %8 {offsets = [128, 0], sizes = [16, 64], strides = [1, 1]} : vector<256x64xf32> to vector<16x64xf32>
    %c0_19 = arith.constant 0 : index
    %c512 = arith.constant 512 : index
    %26 = vector.load %arg8[%c0_19, %c512] : memref<16x1024xf32, #tpu.memory_space<vmem>>, vector<16x64xf32>
    tpu.vector_store %arg8[%c0_19, %c512], %25 {strides = array<i32>} : memref<16x1024xf32, #tpu.memory_space<vmem>>, vector<16x64xf32>,
    %27 = vector.extract_strided_slice %8 {offsets = [144, 0], sizes = [16, 64], strides = [1, 1]} : vector<256x64xf32> to vector<16x64xf32>
    %c0_20 = arith.constant 0 : index
    %c576 = arith.constant 576 : index
    %28 = vector.load %arg8[%c0_20, %c576] : memref<16x1024xf32, #tpu.memory_space<vmem>>, vector<16x64xf32>
    tpu.vector_store %arg8[%c0_20, %c576], %27 {strides = array<i32>} : memref<16x1024xf32, #tpu.memory_space<vmem>>, vector<16x64xf32>,
    %29 = vector.extract_strided_slice %8 {offsets = [160, 0], sizes = [16, 64], strides = [1, 1]} : vector<256x64xf32> to vector<16x64xf32>
    %c0_21 = arith.constant 0 : index
    %c640 = arith.constant 640 : index
    %30 = vector.load %arg8[%c0_21, %c640] : memref<16x1024xf32, #tpu.memory_space<vmem>>, vector<16x64xf32>
    tpu.vector_store %arg8[%c0_21, %c640], %29 {strides = array<i32>} : memref<16x1024xf32, #tpu.memory_space<vmem>>, vector<16x64xf32>,
    %31 = vector.extract_strided_slice %8 {offsets = [176, 0], sizes = [16, 64], strides = [1, 1]} : vector<256x64xf32> to vector<16x64xf32>
    %c0_22 = arith.constant 0 : index
    %c704 = arith.constant 704 : index
    %32 = vector.load %arg8[%c0_22, %c704] : memref<16x1024xf32, #tpu.memory_space<vmem>>, vector<16x64xf32>
    tpu.vector_store %arg8[%c0_22, %c704], %31 {strides = array<i32>} : memref<16x1024xf32, #tpu.memory_space<vmem>>, vector<16x64xf32>,
    %33 = vector.extract_strided_slice %8 {offsets = [192, 0], sizes = [16, 64], strides = [1, 1]} : vector<256x64xf32> to vector<16x64xf32>
    %c0_23 = arith.constant 0 : index
    %c768 = arith.constant 768 : index
    %34 = vector.load %arg8[%c0_23, %c768] : memref<16x1024xf32, #tpu.memory_space<vmem>>, vector<16x64xf32>
    tpu.vector_store %arg8[%c0_23, %c768], %33 {strides = array<i32>} : memref<16x1024xf32, #tpu.memory_space<vmem>>, vector<16x64xf32>,
    %35 = vector.extract_strided_slice %8 {offsets = [208, 0], sizes = [16, 64], strides = [1, 1]} : vector<256x64xf32> to vector<16x64xf32>
    %c0_24 = arith.constant 0 : index
    %c832 = arith.constant 832 : index
    %36 = vector.load %arg8[%c0_24, %c832] : memref<16x1024xf32, #tpu.memory_space<vmem>>, vector<16x64xf32>
    tpu.vector_store %arg8[%c0_24, %c832], %35 {strides = array<i32>} : memref<16x1024xf32, #tpu.memory_space<vmem>>, vector<16x64xf32>,
    %37 = vector.extract_strided_slice %8 {offsets = [224, 0], sizes = [16, 64], strides = [1, 1]} : vector<256x64xf32> to vector<16x64xf32>
    %c0_25 = arith.constant 0 : index
    %c896 = arith.constant 896 : index
    %38 = vector.load %arg8[%c0_25, %c896] : memref<16x1024xf32, #tpu.memory_space<vmem>>, vector<16x64xf32>
    tpu.vector_store %arg8[%c0_25, %c896], %37 {strides = array<i32>} : memref<16x1024xf32, #tpu.memory_space<vmem>>, vector<16x64xf32>,
    %39 = vector.extract_strided_slice %8 {offsets = [240, 0], sizes = [16, 64], strides = [1, 1]} : vector<256x64xf32> to vector<16x64xf32>
    %c0_26 = arith.constant 0 : index
    %c960 = arith.constant 960 : index
    %40 = vector.load %arg8[%c0_26, %c960] : memref<16x1024xf32, #tpu.memory_space<vmem>>, vector<16x64xf32>
    tpu.vector_store %arg8[%c0_26, %c960], %39 {strides = array<i32>} : memref<16x1024xf32, #tpu.memory_space<vmem>>, vector<16x64xf32>,
    %c0_27 = arith.constant 0 : index
    %c0_28 = arith.constant 0 : index
    %41 = vector.load %arg8[%c0_27, %c0_28] : memref<16x1024xf32, #tpu.memory_space<vmem>>, vector<16x1024xf32>
    %42 = arith.addf %4, %41 : vector<16x1024xf32>
    %c0_29 = arith.constant 0 : index
    %c0_30 = arith.constant 0 : index
    %43 = vector.load %arg5[%c0_29, %c0_30] : memref<16x1xf32, #tpu.memory_space<vmem>>, vector<16x1xf32>
    %44 = vector.broadcast %43 : vector<16x1xf32> to vector<16x1024xf32>
    %45 = arith.addf %42, %44 : vector<16x1024xf32>
    %46 = math.absf %45 : vector<16x1024xf32>
    %cst_31 = arith.constant 0.000000e+00 : f32
    %47 = vector.broadcast %cst_31 : f32 to vector<16x1024xf32>
    %48 = arith.subf %47, %46 : vector<16x1024xf32>
    %49 = math.exp %48 : vector<16x1024xf32>
    %cst_32 = arith.constant 1.000000e+00 : f32
    %50 = vector.broadcast %cst_32 : f32 to vector<16x1024xf32>
    %51 = arith.addf %50, %49 : vector<16x1024xf32>
    %52 = tpu.reciprocal %51 {approx = true} : vector<16x1024xf32> -> vector<16x1024xf32>
    %cst_33 = arith.constant 0.000000e+00 : f32
    %53 = vector.broadcast %cst_33 : f32 to vector<16x1024xf32>
    %54 = arith.cmpf oge, %45, %53 : vector<16x1024xf32>
    %55 = arith.mulf %49, %52 : vector<16x1024xf32>
    %56 = arith.select %54, %52, %55 : vector<16x1024xi1>, vector<16x1024xf32>
    %57 = arith.mulf %2, %56 : vector<16x1024xf32>
    %c0_34 = arith.constant 0 : index
    %c0_35 = arith.constant 0 : index
    %c0_36 = arith.constant 0 : index
    %58 = vector.load %arg7[%c0_34, %c0_35, %c0_36] : memref<1x16x1024xf32, #tpu.memory_space<vmem>>, vector<1x16x1024xf32>
    %59 = vector.shape_cast %58 : vector<1x16x1024xf32> to vector<16x1024xf32>
    %60 = vector.shape_cast %57 : vector<16x1024xf32> to vector<1x16x1024xf32>
    tpu.vector_store %arg7[%c0_34, %c0_35, %c0_36], %60 {strides = array<i32>} : memref<1x16x1024xf32, #tpu.memory_space<vmem>>, vector<1x16x1024xf32>,
    return
  }
  func.func @transform_0(%arg0: i32, %arg1: i32) -> (i32, i32, i32) {
    %c0_i32 = arith.constant 0 : i32
    %c0_i32_0 = arith.constant 0 : i32
    return %arg0, %arg1, %c0_i32 : i32, i32, i32
  }
  func.func @transform_1(%arg0: i32, %arg1: i32) -> (i32, i32) {
    %c0_i32 = arith.constant 0 : i32
    %c0_i32_0 = arith.constant 0 : i32
    %c0_i32_1 = arith.constant 0 : i32
    return %c0_i32, %c0_i32_0 : i32, i32
  }
  func.func @transform_2(%arg0: i32, %arg1: i32) -> (i32, i32) {
    %c0_i32 = arith.constant 0 : i32
    %c0_i32_0 = arith.constant 0 : i32
    %c0_i32_1 = arith.constant 0 : i32
    return %c0_i32, %c0_i32_0 : i32, i32
  }
  func.func @transform_3(%arg0: i32, %arg1: i32) -> (i32, i32) {
    %c0_i32 = arith.constant 0 : i32
    %c0_i32_0 = arith.constant 0 : i32
    %c0_i32_1 = arith.constant 0 : i32
    return %c0_i32, %c0_i32_0 : i32, i32
  }
  func.func @transform_4(%arg0: i32, %arg1: i32) -> (i32, i32, i32) {
    %c0_i32 = arith.constant 0 : i32
    %c0_i32_0 = arith.constant 0 : i32
    return %arg0, %c0_i32, %arg1 : i32, i32, i32
  }
  func.func @transform_5(%arg0: i32, %arg1: i32) -> (i32, i32, i32) {
    %c0_i32 = arith.constant 0 : i32
    %c0_i32_0 = arith.constant 0 : i32
    return %arg0, %c0_i32, %arg1 : i32, i32, i32
  }
}

</mosaic_0001>

<bundles_post_ra>
// kernel: esa_forward.1
= control target key start
LH: loop header
LB: loop body
LE: loop exit
PB: predicated region body
PF: predicated region fallthrough
CT: control target
= control target key end

     0   :  { %s1862_s18 = smov 0   ;;  %s1864_s19 = smov 0   ;;  %s2344_s0 = inlined_call_operand.vmem [shape: f32[2,1024,3], index: 0, kind: input, shape index: {}]   ;;  %s2345_s1 = inlined_call_operand.vmem [shape: f32[3,64], index: 1, kind: input, shape index: {}]   ;;  %s2346_s2 = inlined_call_operand.vmem [shape: f32[16,16], index: 2, kind: input, shape index: {}]   ;;  %s2347_s3 = inlined_call_operand.vmem [shape: f32[16,1], index: 3, kind: input, shape index: {}]   ;;  %s2348_s4 = inlined_call_operand.vmem [shape: bf16[2,16,4096], index: 4, kind: input, shape index: {}]   ;;  %s2349_s5 = inlined_call_operand.vmem [shape: f32[2,16,4096], index: 5, kind: output, shape index: {}]  }
   0x1   :  { %s1866_s20 = smov 0   ;;  %s1868_s21 = smov 0  }
   0x2   :  { %s1870_s22 = smov 0   ;;  %s1872_s23 = smov 0  }
   0x3   :  { %s1874_s24 = smov 0  }
   0x4 LB: > { %s24_s25 = sadd.s32 1, %s1819_s22  ;;  %s27_s26 = sadd.s32 1, %s1823_s23  ;;  %s1827_s24 = sphi %s1874_s24, %s15_s24   ;;  %s1823_s23 = sphi %s1872_s23, %s2356_s23   ;;  %s1819_s22 = sphi %s1870_s22, %s2355_s22   ;;  %s1815_s21 = sphi %s1868_s21, %s2354_s21   ;;  %s1811_s20 = sphi %s1866_s20, %s2353_s20   ;;  %s1807_s19 = sphi %s1864_s19, %s2352_s19   ;;  %s1803_s18 = sphi %s1862_s18, %s2351_s18  }
   0x5   : > { %p25_p0 = scmp.ge.s32.totalorder %s24_s25, 4  ;;  %s1478_s27 = sadd.s32 4294967295, %s1827_s24  }
   0x6   : > { %p134_p1 = scmp.ne.s32.totalorder %s1807_s19, %s1803_s18  ;;  %p135_p2 = scmp.eq.s32.totalorder %s1827_s24, 0 }
   0x7   : > { %s2358_s25 = smov (%p25_p0, %s24_s25), 0  ;;  %s2360_s26 = smov (!%p25_p0, %s27_s26), %s1823_s23 }
   0x8   : > { %p29_p3 = scmp.ge.s32.totalorder %s2360_s26, 2  ;;  %p166_p4 = scmp.eq.s32.totalorder %s1478_s27, 7 }
   0x9   : > { %s123_s28 = ssub.s32 %s1819_s22, %s2358_s25  ;;  %p136_p5 = por %p135_p2, %p134_p1 }
   0xa   : > { %s2362_s26 = smov (%p29_p3, %s2360_s26), 0  ;;  %p1910_p6 = por %p166_p4, %p134_p1 }
   0xb   : > { %s122_s30 = ssub.s32 %s1823_s23, %s2362_s26  ;;  %s127_s7 = sadd.s32 1, %s1807_s19 }
   0xc   : > { %s124_s6 = sor.u32 %s123_s28, %s122_s30  ;;  %p1481_p8 = scmp.ge.s32.totalorder %s1827_s24, 8 }
   0xd   : > { %p125_p7 = scmp.eq.s32.totalorder %s124_s6, 0 }
   0xe   : > { %197 = sbr.rel (%p1481_p8) target bundleno = 32 (0x20), region = 28 }
   0xf   : > { %s1918_s8 = scalar_select %p125_p7, %s1807_s19, %s127_s7  }
  0x15   : > { %213 = sbr.rel (!%p136_p5) target bundleno = 32 (0x20), region = 36  ;;  %s215_s9 = sand.u32 (%p136_p5), 1, %s1807_s19  }
  0x16   : > { %s1483_s10 = sshll.u32 (%p136_p5), %s1819_s22, 3  ;;  %s1482_s11 = sshll.u32 (%p136_p5), %s215_s9, 6 }
  0x17   : > { %s1484_s12 = sshll.u32 (%p136_p5), %s1823_s23, 6  ;;  %s217_s27 = scalar_lea.vmem (%p136_p5), [#allocation3], %s1482_s11 }
  0x18   : > { %s220_s13 = sadd.s32 (%p136_p5), %s1484_s12, %s1483_s10 }
  0x19   : > { %s1485_s14 = sshll.u32 (%p136_p5), %s220_s13, 2 }
  0x1a   : > { %s222_s17 = scalar_lea.vmem (%p136_p5), %s2348_s4, %s1485_s14 }
  0x1b   : > { %v235_v0 = vld [vmem:[%s222_s17] sm:$0xff] (%p136_p5)  ;;  %v237_v1 = vld [vmem:[%s222_s17 + $0x8] sm:$0xff] (%p136_p5)  ;;  %v239_v2 = vld [vmem:[%s222_s17 + $0x10] sm:$0xff] (%p136_p5) }
  0x1c   : > { %236 = vst [vmem:[%s217_s27] sm:$0xff] %v235_v0  ;;  %238 = vst [vmem:[%s217_s27 + $0x8] sm:$0xff] %v237_v1  ;;  %v241_v3 = vld [vmem:[%s222_s17 + $0x18] sm:$0xff]  ;;  %v243_v4 = vld [vmem:[%s222_s17 + $0x80] sm:$0xff] }
  0x1d   : > { %240 = vst [vmem:[%s217_s27 + $0x10] sm:$0xff] %v239_v2  ;;  %v245_v5 = vld [vmem:[%s222_s17 + $0x88] sm:$0xff]  ;;  %242 = vst [vmem:[%s217_s27 + $0x18] sm:$0xff] %v241_v3  ;;  %v247_v6 = vld [vmem:[%s222_s17 + $0x90] sm:$0xff] }
  0x1e   : > { %244 = vst [vmem:[%s217_s27 + $0x20] sm:$0xff] %v243_v4  ;;  %246 = vst [vmem:[%s217_s27 + $0x28] sm:$0xff] %v245_v5  ;;  %v249_v7 = vld [vmem:[%s222_s17 + $0x98] sm:$0xff] }
  0x1f   : > { %248 = vst [vmem:[%s217_s27 + $0x30] sm:$0xff] %v247_v6  ;;  %250 = vst [vmem:[%s217_s27 + $0x38] sm:$0xff] %v249_v7 }
  0x20 PF: > { %p1486_p9 = scmp.ge.s32.totalorder %s1827_s24, 1  ;;  %p255_p10 = scmp.lt.s32.totalorder %s1827_s24, 9 }
  0x22   : > { %p256_p11 = pnand %p1486_p9, %p255_p10 }
  0x23   : > { %v367_v8 = vld [vmem:[%s2345_s1] sm:$0x7] (!%p256_p11)  ;;  %vm465_vm0 = vcmask (!%p256_p11), 1042432   ;;  %s1489_s6 = sshll.u32 (!%p256_p11), %s1811_s20, 5  ;;  %p298_p12 = scmp.lt.s32.totalorder (!%p256_p11), %s1815_s21, 1  ;;  %vm368_vm1 = vcmask (!%p256_p11), 23552  }
  0x24   : > { %259 = sbr.rel (%p256_p11) target bundleno = 512 (0x200), region = 59  ;;  %1572 = vmatprep.subr.msk.mxu0 (!%p256_p11), %vm465_vm0, %v367_v8  ;;  %p300_p13 = scmp.lt.s32.totalorder (!%p256_p11), %s1489_s6, 127  ;;  %1638 = vmatprep.subr.msk.mxu1 (!%p256_p11), %vm465_vm0, %v367_v8  ;;  %v1829_v37 = vmov (!%p256_p11), 0.0   ;;  %v333_v38 = vld [vmem:[%s2346_s2] sm:$0xff] (!%p256_p11)  ;;  %vm808_vm2 = vcmask (!%p256_p11), 130048   ;;  %v334_v43 = vld [vmem:[%s2346_s2 + $0x8] sm:$0xff] (!%p256_p11) }
  0x25   : > { %s262_s7 = sand.u32 (!%p256_p11), 1, %s1803_s18   ;;  %1573 = vmatpush3.msk.msra.mxu0 (!%p256_p11), %vm465_vm0, %v367_v8  ;;  %1639 = vmatpush3.msk.msra.mxu1 (!%p256_p11), %vm465_vm0, %v367_v8  ;;  %v1830_v60 = vmov (!%p256_p11), 0   ;;  %vm694_vm3 = vcmask (!%p256_p11), 523264   ;;  %vm705_vm4 = vcmask (!%p256_p11), 1048064  }
  0x26   : > { %s1487_s11 = sshll.u32 (!%p256_p11), %s262_s7, 6  ;;  %1708 = vset.pattern.permute.xlu1 (!%p256_p11), %v1830_v60  ;;  %1707 = vset.pattern.permute.xlu0 (!%p256_p11), %v1830_v60 }
  0x27   : > { %s1938_s14 = scalar_lea.vmem (!%p256_p11), [#allocation3], %s1487_s11 }
  0x28   : > { %v1941_v9 = vld [vmem:[%s1938_s14] sm:$0xff] (!%p256_p11)  ;;  %v1952_v11 = vld [vmem:[%s1938_s14 + $0x8] sm:$0xff] (!%p256_p11)  ;;  %v1996_v33 = vld [vmem:[%s1938_s14 + $0x10] sm:$0xff] (!%p256_p11) }
  0x29   : > { %v1944_v10 = vld [vmem:[%s1938_s14 + $0x20] sm:$0xff] (!%p256_p11)  ;;  %v1955_v12 = vld [vmem:[%s1938_s14 + $0x28] sm:$0xff] (!%p256_p11)  ;;  %v1999_v34 = vld [vmem:[%s1938_s14 + $0x30] sm:$0xff] (!%p256_p11) }
  0x2a   : > { %v1640_v16 = vcombine.high (!%p256_p11), %v1941_v9, %v1944_v10  ;;  %v1641_v19 = vcombine.low (!%p256_p11), %v1941_v9, %v1944_v10  ;;  %v1642_v21 = vcombine.high (!%p256_p11), %v1952_v11, %v1955_v12  ;;  %v1643_v39 = vcombine.low (!%p256_p11), %v1952_v11, %v1955_v12  ;;  %v2022_v44 = vld [vmem:[%s1938_s14 + $0x18] sm:$0xff] (!%p256_p11) }
  0x2b   : > { %s299_s9 = scalar_select %p298_p12, %s1815_s21, 1  ;;  %v1644_v40 = vcombine.high %v1996_v33, %v1999_v34  ;;  %v2025_v45 = vld [vmem:[%s1938_s14 + $0x38] sm:$0xff]  ;;  %v1645_v48 = vcombine.low %v1996_v33, %v1999_v34 }
  0x2c   : > { %s2364_s6 = smov (!%p300_p13, %s1489_s6), 127  ;;  %1623 = vmatprep.subr.bf16.mxu1 %v1640_v16  ;;  %v1646_v49 = vcombine.high %v2022_v44, %v2025_v45  ;;  %v1647_v54 = vcombine.low %v2022_v44, %v2025_v45  ;;  %s2241_s14 = sshll.u32 %s262_s7, 7 }
  0x2d   : > { %s1490_s10 = sshll.u32 %s299_s9, 7  ;;  %s1831_s9 = smov 64  }
  0x2e   : > { %s303_s12 = sadd.s32 %s1490_s10, %s2364_s6  ;;  %s2260_s18 = scalar_lea.vmem [#allocation4], %s2241_s14 }
  0x2f   : > { %s1491_s13 = sshll.u32 %s303_s12, 3  ;;  %s1534_s7 = sshll.u32 (%p1910_p6), %s1811_s20, 3 }
  0x30   : > { %s1949_s17 = scalar_lea.vmem %s2344_s0, %s1491_s13  ;;  %s1535_s15 = sshll.u32 (%p1910_p6), %s1815_s21, 6 }
  0x31   : > { %v335_v13 = vld [vmem:[%s1949_s17] sm:$0xff]  ;;  %v336_v14 = vld [vmem:[%s1949_s17 + $0x8] sm:$0xff]  ;;  %v337_v15 = vld [vmem:[%s1949_s17 + $0x10] sm:$0xff]  ;;  %s1336_s29 = sadd.s32 (%p1910_p6), %s1535_s15, %s1534_s7 }
  0x32   : > { %1574 = vmatprep.mubr.msk.f32.mxu0 %vm368_vm1, %v335_v13  ;;  %v359_v17 = vld [vmem:[%s1949_s17 + $0xc0] sm:$0xff]  ;;  %v360_v18 = vld [vmem:[%s1949_s17 + $0xc8] sm:$0xff]  ;;  %v361_v20 = vld [vmem:[%s1949_s17 + $0xd0] sm:$0xff]  ;;  %s1536_s16 = sshll.u32 (%p1910_p6), %s1336_s29, 3 }
  0x33   : > { %1575 = vmatmul.mubr.msk.f32.vlgmr.msra.gmra.mrb[0].mxu0 %vm368_vm1, %v336_v14  ;;  %1610 = vmatprep.mubr.msk.f32.mxu1 %vm368_vm1, %v359_v17  ;;  %v338_v22 = vld [vmem:[%s1949_s17 + $0x18] sm:$0xff]  ;;  %v339_v23 = vld [vmem:[%s1949_s17 + $0x20] sm:$0xff]  ;;  %v340_v26 = vld [vmem:[%s1949_s17 + $0x28] sm:$0xff]  ;;  %s1338_s28 = scalar_lea.vmem (%p1910_p6), %s2349_s5, %s1536_s16 }
  0x34   : > { %1577 = vmatprep.mubr.msk.f32.mxu0 %vm368_vm1, %v337_v15  ;;  %1611 = vmatmul.mubr.msk.f32.vlgmr.msra.gmra.mrb[0].mxu1 %vm368_vm1, %v360_v18  ;;  %v362_v24 = vld [vmem:[%s1949_s17 + $0xd8] sm:$0xff]  ;;  %v363_v25 = vld [vmem:[%s1949_s17 + $0xe0] sm:$0xff]  ;;  %v341_v27 = vld [vmem:[%s1949_s17 + $0x30] sm:$0xff] }
  0x35   : > { %1613 = vmatprep.mubr.msk.f32.mxu1 %vm368_vm1, %v361_v20  ;;  %1625 = vmatpush1.bf16.msra.mxu1 %v1641_v19  ;;  %v364_v28 = vld [vmem:[%s1949_s17 + $0xe8] sm:$0xff]  ;;  %v365_v29 = vld [vmem:[%s1949_s17 + $0xf0] sm:$0xff]  ;;  %v342_v30 = vld [vmem:[%s1949_s17 + $0x38] sm:$0xff] }
  0x36   : > { %1627 = vmatprep.subr.bf16.mxu1 %v1642_v21  ;;  %v343_v31 = vld [vmem:[%s1949_s17 + $0x40] sm:$0xff]  ;;  %v366_v32 = vld [vmem:[%s1949_s17 + $0xf8] sm:$0xff]  ;;  %v344_v35 = vld [vmem:[%s1949_s17 + $0x48] sm:$0xff] }
  0x37   : > { %1578 = vmatmul.mubr.msk.f32.gmra.mrb[2].mxu0 %vm368_vm1, %v338_v22  ;;  %v345_v36 = vld [vmem:[%s1949_s17 + $0x50] sm:$0xff]  ;;  %v346_v41 = vld [vmem:[%s1949_s17 + $0x58] sm:$0xff]  ;;  %v347_v42 = vld [vmem:[%s1949_s17 + $0x60] sm:$0xff] }
  0x38   : > { %1580 = vmatprep.mubr.msk.f32.mxu0 %vm368_vm1, %v339_v23  ;;  %1614 = vmatmul.mubr.msk.f32.gmra.mrb[2].mxu1 %vm368_vm1, %v362_v24  ;;  %v348_v46 = vld [vmem:[%s1949_s17 + $0x68] sm:$0xff]  ;;  %v349_v47 = vld [vmem:[%s1949_s17 + $0x70] sm:$0xff]  ;;  %v350_v50 = vld [vmem:[%s1949_s17 + $0x78] sm:$0xff] }
  0x39   : > { %1616 = vmatprep.mubr.msk.f32.mxu1 %vm368_vm1, %v363_v25  ;;  %v351_v51 = vld [vmem:[%s1949_s17 + $0x80] sm:$0xff]  ;;  %v352_v52 = vld [vmem:[%s1949_s17 + $0x88] sm:$0xff]  ;;  %v353_v53 = vld [vmem:[%s1949_s17 + $0x90] sm:$0xff] }
  0x3a   : > { %v354_v55 = vld [vmem:[%s1949_s17 + $0x98] sm:$0xff]  ;;  %v355_v56 = vld [vmem:[%s1949_s17 + $0xa0] sm:$0xff]  ;;  %v356_v57 = vld [vmem:[%s1949_s17 + $0xa8] sm:$0xff] }
  0x3b   : > { %1581 = vmatmul.mubr.msk.f32.gmra.mrb[4].mxu0 %vm368_vm1, %v340_v26  ;;  %v357_v58 = vld [vmem:[%s1949_s17 + $0xb0] sm:$0xff]  ;;  %v358_v59 = vld [vmem:[%s1949_s17 + $0xb8] sm:$0xff] }
  0x3c   : > { %1583 = vmatprep.mubr.msk.f32.mxu0 %vm368_vm1, %v341_v27  ;;  %1617 = vmatmul.mubr.msk.f32.gmra.mrb[4].mxu1 %vm368_vm1, %v364_v28 }
  0x3d   : > { %1619 = vmatprep.mubr.msk.f32.mxu1 %vm368_vm1, %v365_v29 }
  0x3f   : > { %1584 = vmatmul.mubr.msk.f32.gmra.mrb[6].mxu0 %vm368_vm1, %v342_v30 }
  0x40   : > { %1586 = vmatprep.mubr.msk.f32.mxu0 %vm368_vm1, %v343_v31  ;;  %1620 = vmatmul.mubr.msk.f32.gmra.mrb[6].mxu1 %vm368_vm1, %v366_v32 }
  0x41   : > { %879 = vmatprep.mubr.f32.mxu1 %v1829_v37 }
  0x43   : > { %1587 = vmatmul.mubr.msk.f32.gmra.mrb[8].mxu0 %vm368_vm1, %v344_v35 }
  0x44   : > { %1589 = vmatprep.mubr.msk.f32.mxu0 %vm368_vm1, %v345_v36  ;;  %1525 = vmatmul.mubr.msk.f32.vlgmr.msra.gmra.mrb[8].mxu1 %vm808_vm2, %v333_v38 }
  0x45   : > { %885 = vmatprep.mubr.f32.mxu1 %v1829_v37  ;;  %1629 = vmatpush1.bf16.msra.mxu1 %v1643_v39 }
  0x46   : > { %1631 = vmatprep.subr.bf16.mxu1 %v1644_v40 }
  0x47   : > { %1590 = vmatmul.mubr.msk.f32.gmra.mrb[10].mxu0 %vm368_vm1, %v346_v41 }
  0x48   : > { %1592 = vmatprep.mubr.msk.f32.mxu0 %vm368_vm1, %v347_v42  ;;  %1526 = vmatmul.mubr.msk.f32.gmra.mrb[10].mxu1 %vm808_vm2, %v334_v43 }
  0x49   : > { %956 = vmatprep.mubr.f32.mxu1 %v1829_v37 }
  0x4b   : > { %1593 = vmatmul.mubr.msk.f32.gmra.mrb[12].mxu0 %vm368_vm1, %v348_v46 }
  0x4c   : > { %1595 = vmatprep.mubr.msk.f32.mxu0 %vm368_vm1, %v349_v47  ;;  %1527 = vmatmul.mubr.msk.f32.vlgmr.msra.gmra.mrb[12].mxu1 %vm808_vm2, %v333_v38 }
  0x4d   : > { %962 = vmatprep.mubr.f32.mxu1 %v1829_v37  ;;  %1633 = vmatpush1.bf16.msra.mxu1 %v1645_v48 }
  0x4e   : > { %1635 = vmatprep.subr.bf16.mxu1 %v1646_v49 }
  0x4f   : > { %1596 = vmatmul.mubr.msk.f32.gmra.mrb[14].mxu0 %vm368_vm1, %v350_v50 }
  0x50   : > { %1598 = vmatprep.mubr.msk.f32.mxu0 %vm368_vm1, %v351_v51  ;;  %1528 = vmatmul.mubr.msk.f32.gmra.mrb[14].mxu1 %vm808_vm2, %v334_v43 }
  0x51   : > { %1033 = vmatprep.mubr.f32.mxu1 %v1829_v37 }
  0x53   : > { %1599 = vmatmul.mubr.msk.f32.gmra.mrb[16].mxu0 %vm368_vm1, %v352_v52  ;;  %v1124_v52 = vld [vmem:[%s2347_s3 + $0x8] sm:$0xff] }
  0x54   : > { %1601 = vmatprep.mubr.msk.f32.mxu0 %vm368_vm1, %v353_v53  ;;  %1529 = vmatmul.mubr.msk.f32.vlgmr.msra.gmra.mrb[16].mxu1 %vm808_vm2, %v333_v38 }
  0x55   : > { %1039 = vmatprep.mubr.f32.mxu1 %v1829_v37  ;;  %1637 = vmatpush1.bf16.msra.mxu1 %v1647_v54  ;;  %v1123_v54 = vld [vmem:[%s2347_s3] sm:$0xff] }
  0x57   : > { %1602 = vmatmul.mubr.msk.f32.gmra.mrb[18].mxu0 %vm368_vm1, %v354_v55 }
  0x58   : > { %1604 = vmatprep.mubr.msk.f32.mxu0 %vm368_vm1, %v355_v56  ;;  %1530 = vmatmul.mubr.msk.f32.gmra.mrb[18].mxu1 %vm808_vm2, %v334_v43 }
  0x59   : > { %1110 = vmatprep.mubr.f32.mxu1 %v1829_v37 }
  0x5b   : > { %1605 = vmatmul.mubr.msk.f32.gmra.mrb[20].mxu0 %vm368_vm1, %v356_v57 }
  0x5c   : > { %1607 = vmatprep.mubr.msk.f32.mxu0 %vm368_vm1, %v357_v58  ;;  %1531 = vmatmul.mubr.msk.f32.vlgmr.msra.gmra.mrb[20].mxu1 %vm808_vm2, %v333_v38 }
  0x5d   : > { %1116 = vmatprep.mubr.f32.mxu1 %v1829_v37 }
  0x5f   : > { %1608 = vmatmul.mubr.msk.f32.gmra.mrb[22].mxu0 %vm368_vm1, %v358_v59 }
  0x60   : > { %1532 = vmatmul.mubr.msk.f32.gmra.mrb[22].mxu1 %vm808_vm2, %v334_v43 }
 0x106   : > { %v1576_v61 = vpop.f32.mrb[0].mxu0 }
 0x107   : > { %696 = vst.msk [vmem:[#allocation2 + $0x40] sm:$0xff] %vm694_vm3, %v1576_v61  ;;  %v535_v62 = vpop.f32.mrb[1].mxu0  ;;  %v1612_v63 = vpop.f32.mrb[0].mxu1 }
 0x108   : > { %695 = vst.msk [vmem:[#allocation2] sm:$0xff] %vm694_vm3, %v535_v62  ;;  %769 = vst.msk [vmem:[#allocation2 + $0x70] sm:$0xff] %vm694_vm3, %v1612_v63  ;;  %v655_v0 = vpop.f32.mrb[1].mxu1 }
 0x109   : > { %768 = vst.msk [vmem:[#allocation2 + $0x30] sm:$0xff] %vm694_vm3, %v655_v0 }
 0x10a   : > { %v1579_v1 = vpop.f32.mrb[2].mxu0 }
 0x10b   : > { %701 = vrot.lane.b32.xlu0 %v1579_v1, %s1831_s9  ;;  %v545_v2 = vpop.f32.mrb[3].mxu0  ;;  %v1615_v3 = vpop.f32.mrb[2].mxu1 }
 0x10c   : > { %774 = vrot.lane.b32.xlu1 %v1615_v3, %s1831_s9  ;;  %v665_v4 = vpop.f32.mrb[3].mxu1 }
 0x10e   : > { %v1582_v5 = vpop.f32.mrb[4].mxu0 }
 0x10f   : > { %709 = vst.msk [vmem:[#allocation2 + $0x48] sm:$0xff] %vm694_vm3, %v1582_v5  ;;  %699 = vrot.lane.b32.xlu0 %v545_v2, %s1831_s9  ;;  %v555_v6 = vpop.f32.mrb[5].mxu0  ;;  %v1618_v7 = vpop.f32.mrb[4].mxu1 }
 0x110   : > { %708 = vst.msk [vmem:[#allocation2 + $0x8] sm:$0xff] %vm694_vm3, %v555_v6  ;;  %781 = vst.msk [vmem:[#allocation2 + $0x78] sm:$0xff] %vm694_vm3, %v1618_v7  ;;  %v675_v8 = vpop.f32.mrb[5].mxu1 }
 0x111   : > { %780 = vst.msk [vmem:[#allocation2 + $0x38] sm:$0xff] %vm694_vm3, %v675_v8 }
 0x112   : > { %v1585_v13 = vpop.f32.mrb[6].mxu0 }
 0x113   : > { %714 = vrot.lane.b32.xlu1 %v1585_v13, %s1831_s9  ;;  %v565_v14 = vpop.f32.mrb[7].mxu0  ;;  %772 = vrot.lane.b32.xlu0 %v665_v4, %s1831_s9  ;;  %v1621_v15 = vpop.f32.mrb[6].mxu1 }
 0x114   : > { %v685_v16 = vpop.f32.mrb[7].mxu1 }
 0x116   : > { %v1588_v17 = vpop.f32.mrb[8].mxu0 }
 0x117   : > { %721 = vst.msk [vmem:[#allocation2 + $0x50] sm:$0xff] %vm694_vm3, %v1588_v17  ;;  %786 = vrot.lane.b32.xlu1 %v1621_v15, %s1831_s9  ;;  %v575_v18 = vpop.f32.mrb[9].mxu0  ;;  %784 = vrot.lane.b32.xlu0 %v685_v16, %s1831_s9  ;;  %v2079_v19 = vpop.f32.mrb[8].mxu1 }
 0x118   : > { %720 = vst.msk [vmem:[#allocation2 + $0x10] sm:$0xff] %vm694_vm3, %v575_v18  ;;  %v2082_v20 = vpop.f32.mrb[9].mxu1 }
 0x11a   : > { %v1591_v21 = vpop.f32.mrb[10].mxu0 }
 0x11b   : > { %712 = vrot.lane.b32.xlu1 %v565_v14, %s1831_s9  ;;  %v585_v22 = vpop.f32.mrb[11].mxu0  ;;  %v2085_v23 = vpop.f32.mrb[10].mxu1 }
 0x11c   : > { %724 = vrot.lane.b32.xlu0 %v585_v22, %s1831_s9  ;;  %v2088_v24 = vpop.f32.mrb[11].mxu1 }
 0x11e   : > { %v1594_v25 = vpop.f32.mrb[12].mxu0 }
 0x11f   : > { %733 = vst.msk [vmem:[#allocation2 + $0x58] sm:$0xff] %vm694_vm3, %v1594_v25  ;;  %726 = vrot.lane.b32.xlu1 %v1591_v21, %s1831_s9  ;;  %v595_v26 = vpop.f32.mrb[13].mxu0  ;;  %v2092_v27 = vpop.f32.mrb[12].mxu1 }
 0x120   : > { %732 = vst.msk [vmem:[#allocation2 + $0x18] sm:$0xff] %vm694_vm3, %v595_v26  ;;  %v2095_v28 = vpop.f32.mrb[13].mxu1 }
 0x122   : > { %v1597_v29 = vpop.f32.mrb[14].mxu0 }
 0x123   : > { %738 = vrot.lane.b32.xlu1 %v1597_v29, %s1831_s9  ;;  %v605_v30 = vpop.f32.mrb[15].mxu0  ;;  %v2098_v31 = vpop.f32.mrb[14].mxu1 }
 0x124   : > { %736 = vrot.lane.b32.xlu0 %v605_v30, %s1831_s9  ;;  %v2101_v32 = vpop.f32.mrb[15].mxu1 }
 0x126   : > { %v1600_v35 = vpop.f32.mrb[16].mxu0 }
 0x127   : > { %745 = vst.msk [vmem:[#allocation2 + $0x60] sm:$0xff] %vm694_vm3, %v1600_v35  ;;  %v615_v36 = vpop.f32.mrb[17].mxu0  ;;  %v2104_v37 = vpop.f32.mrb[16].mxu1 }
 0x128   : > { %744 = vst.msk [vmem:[#allocation2 + $0x20] sm:$0xff] %vm694_vm3, %v615_v36  ;;  %v2107_v38 = vpop.f32.mrb[17].mxu1 }
 0x12a   : > { %v1603_v39 = vpop.f32.mrb[18].mxu0 }
 0x12b   : > { %750 = vrot.lane.b32.xlu1 %v1603_v39, %s1831_s9  ;;  %v625_v40 = vpop.f32.mrb[19].mxu0  ;;  %v2110_v41 = vpop.f32.mrb[18].mxu1 }
 0x12c   : > { %748 = vrot.lane.b32.xlu0 %v625_v40, %s1831_s9  ;;  %v2113_v42 = vpop.f32.mrb[19].mxu1 }
 0x12e   : > { %v1606_v43 = vpop.f32.mrb[20].mxu0 }
 0x12f   : > { %757 = vst.msk [vmem:[#allocation2 + $0x68] sm:$0xff] %vm694_vm3, %v1606_v43  ;;  %v635_v46 = vpop.f32.mrb[21].mxu0  ;;  %v2116_v47 = vpop.f32.mrb[20].mxu1 }
 0x130   : > { %756 = vst.msk [vmem:[#allocation2 + $0x28] sm:$0xff] %vm694_vm3, %v635_v46  ;;  %v2119_v48 = vpop.f32.mrb[21].mxu1 }
 0x132   : > { %v1609_v49 = vpop.f32.mrb[22].mxu0 }
 0x133   : > { %762 = vrot.lane.b32.xlu1 %v1609_v49, %s1831_s9  ;;  %v645_v50 = vpop.f32.mrb[23].mxu0  ;;  %v1118_v51 = vpop.f32.mrb[22].mxu1 }
 0x134   : > { %760 = vrot.lane.b32.xlu0 %v645_v50, %s1831_s9  ;;  %v1120_v53 = vpop.f32.mrb[23].mxu1 }
 0x137   : > { %1132 = vperm.xlu1 %1708, %v1124_v52  }
 0x138   : > { %1127 = vperm.xlu0 %1707, %v1123_v54  }
 0x17d   : > { %v702_v55 = vpop.permute.xlu0 %701 }
 0x17e   : > { %707 = vst.msk [vmem:[#allocation2 + $0x40] sm:$0xff] %vm705_vm4, %v702_v55  ;;  %v775_v56 = vpop.permute.xlu1 %774 }
 0x17f   : > { %779 = vst.msk [vmem:[#allocation2 + $0x70] sm:$0xff] %vm705_vm4, %v775_v56 }
 0x181   : > { %v700_v57 = vpop.permute.xlu0 %699 }
 0x182   : > { %706 = vst.msk [vmem:[#allocation2] sm:$0xff] %vm705_vm4, %v700_v57 }
 0x185   : > { %v715_v58 = vpop.permute.xlu1 %714  ;;  %v773_v59 = vpop.permute.xlu0 %772  ;;  %v800_v7 = vld [vmem:[#allocation2 + $0x40] sm:$0xff] }
 0x186   : > { %719 = vst.msk [vmem:[#allocation2 + $0x48] sm:$0xff] %vm705_vm4, %v715_v58  ;;  %778 = vst.msk [vmem:[#allocation2 + $0x30] sm:$0xff] %vm705_vm4, %v773_v59  ;;  %v806_v8 = vld [vmem:[#allocation2 + $0x70] sm:$0xff]  ;;  %v888_v21 = vadd.f32 %v2085_v23, %v800_v7 }
 0x187   : > { %v1119_v29 = vadd.f32 %v1118_v51, %v806_v8 }
 0x189   : > { %v787_v60 = vpop.permute.xlu1 %786  ;;  %v785_v61 = vpop.permute.xlu0 %784  ;;  %v792_v50 = vld [vmem:[#allocation2] sm:$0xff] }
 0x18a   : > { %791 = vst.msk [vmem:[#allocation2 + $0x78] sm:$0xff] %vm705_vm4, %v787_v60  ;;  %790 = vst.msk [vmem:[#allocation2 + $0x38] sm:$0xff] %vm705_vm4, %v785_v61 }
 0x18d   : > { %v713_v62 = vpop.permute.xlu1 %712  ;;  %v801_v13 = vld [vmem:[#allocation2 + $0x48] sm:$0xff] }
 0x18e   : > { %718 = vst.msk [vmem:[#allocation2 + $0x8] sm:$0xff] %vm705_vm4, %v713_v62  ;;  %v725_v63 = vpop.permute.xlu0 %724  ;;  %v890_v22 = vadd.f32 %v2088_v24, %v801_v13 }
 0x18f   : > { %730 = vst.msk [vmem:[#allocation2 + $0x10] sm:$0xff] %vm705_vm4, %v725_v63 }
 0x191   : > { %v727_v0 = vpop.permute.xlu1 %726  ;;  %v807_v16 = vld [vmem:[#allocation2 + $0x78] sm:$0xff] }
 0x192   : > { %731 = vst.msk [vmem:[#allocation2 + $0x50] sm:$0xff] %vm705_vm4, %v727_v0  ;;  %v1121_v30 = vadd.f32 %v1120_v53, %v807_v16 }
 0x195   : > { %v739_v1 = vpop.permute.xlu1 %738  ;;  %v793_v8 = vld [vmem:[#allocation2 + $0x8] sm:$0xff] }
 0x196   : > { %743 = vst.msk [vmem:[#allocation2 + $0x58] sm:$0xff] %vm705_vm4, %v739_v1  ;;  %v737_v2 = vpop.permute.xlu0 %736 }
 0x197   : > { %742 = vst.msk [vmem:[#allocation2 + $0x18] sm:$0xff] %vm705_vm4, %v737_v2 }
 0x199   : > { %v802_v14 = vld [vmem:[#allocation2 + $0x50] sm:$0xff] }
 0x19a   : > { %v965_v25 = vadd.f32 %v2098_v31, %v802_v14  ;;  %v794_v14 = vld [vmem:[#allocation2 + $0x10] sm:$0xff] }
 0x19d   : > { %v751_v3 = vpop.permute.xlu1 %750  ;;  %v803_v15 = vld [vmem:[#allocation2 + $0x58] sm:$0xff] }
 0x19e   : > { %755 = vst.msk [vmem:[#allocation2 + $0x60] sm:$0xff] %vm705_vm4, %v751_v3  ;;  %v749_v4 = vpop.permute.xlu0 %748  ;;  %v967_v26 = vadd.f32 %v2101_v32, %v803_v15  ;;  %v882_v3 = vadd.f32 %v2079_v19, %v792_v50 }
 0x19f   : > { %754 = vst.msk [vmem:[#allocation2 + $0x20] sm:$0xff] %vm705_vm4, %v749_v4 }
 0x1a5   : > { %v763_v5 = vpop.permute.xlu1 %762  ;;  %v804_v17 = vld [vmem:[#allocation2 + $0x60] sm:$0xff] }
 0x1a6   : > { %767 = vst.msk [vmem:[#allocation2 + $0x68] sm:$0xff] %vm705_vm4, %v763_v5  ;;  %v761_v6 = vpop.permute.xlu0 %760  ;;  %v1042_v36 = vadd.f32 %v2110_v41, %v804_v17  ;;  %v795_v17 = vld [vmem:[#allocation2 + $0x18] sm:$0xff] }
 0x1a7   : > { %766 = vst.msk [vmem:[#allocation2 + $0x28] sm:$0xff] %vm705_vm4, %v761_v6 }
 0x1ad   : > { %v805_v18 = vld [vmem:[#allocation2 + $0x68] sm:$0xff] }
 0x1ae   : > { %v1044_v39 = vadd.f32 %v2113_v42, %v805_v18  ;;  %v797_v19 = vld [vmem:[#allocation2 + $0x28] sm:$0xff] }
 0x1b6   : > { %v1133_v35 = vpop.permute.xlu1 %1132 }
 0x1b7   : > { %v2151_v40 = vadd.f32 %v1133_v35, %v888_v21  ;;  %v2153_v43 = vadd.f32 %v1133_v35, %v890_v22  ;;  %v2155_v46 = vadd.f32 %v1133_v35, %v965_v25  ;;  %v2157_v23 = vadd.f32 %v1133_v35, %v967_v26  ;;  %v1128_v2 = vpop.permute.xlu0 %1127  ;;  %v796_v21 = vld [vmem:[#allocation2 + $0x20] sm:$0xff]  ;;  %v798_v26 = vld [vmem:[#allocation2 + $0x30] sm:$0xff] }
 0x1b8   : > { %v2159_v24 = vadd.f32 %v1133_v35, %v1042_v36  ;;  %v2161_v31 = vadd.f32 %v1133_v35, %v1044_v39  ;;  %v2163_v32 = vadd.f32 %v1133_v35, %v1119_v29  ;;  %v2165_v49 = vadd.f32 %v1133_v35, %v1121_v30  ;;  %v799_v36 = vld [vmem:[#allocation2 + $0x38] sm:$0xff] }
 0x1b9   : > { %v1159_v41 = vand.u32 2147483647, %v2151_v40  ;;  %v1160_v42 = vand.u32 2147483647, %v2153_v43  ;;  %v1161_v51 = vand.u32 2147483647, %v2155_v46  ;;  %v2176_v15 = vadd.f32 %v1128_v2, %v882_v3 }
 0x1ba   : > { %v1162_v52 = vand.u32 2147483647, %v2157_v23  ;;  %v1163_v53 = vand.u32 2147483647, %v2159_v24  ;;  %v1164_v54 = vand.u32 2147483647, %v2161_v31  ;;  %v884_v22 = vadd.f32 %v2082_v20, %v793_v8 }
 0x1bb   : > { %v1165_v55 = vand.u32 2147483647, %v2163_v32  ;;  %v1166_v56 = vand.u32 2147483647, %v2165_v49  ;;  %v1175_v57 = vsub.f32 0.0, %v1159_v41  ;;  %v1176_v58 = vsub.f32 0.0, %v1160_v42 }
 0x1bc   : > { %v1177_v59 = vsub.f32 0.0, %v1161_v51  ;;  %v1178_v60 = vsub.f32 0.0, %v1162_v52  ;;  %v1179_v61 = vsub.f32 0.0, %v1163_v53  ;;  %v1180_v62 = vsub.f32 0.0, %v1164_v54 }
 0x1bd   : > { %v1181_v63 = vsub.f32 0.0, %v1165_v55  ;;  %v1199_v0 = vmul.f32 1.442695, %v1175_v57  ;;  %v1201_v1 = vmul.f32 1.442695, %v1176_v58  ;;  %v1182_v4 = vsub.f32 0.0, %v1166_v56 }
 0x1be   : > { %v1203_v5 = vmul.f32 1.442695, %v1177_v59  ;;  %v1205_v6 = vmul.f32 1.442695, %v1178_v60  ;;  %v1207_v7 = vmul.f32 1.442695, %v1179_v61  ;;  %v959_v25 = vadd.f32 %v2092_v27, %v794_v14 }
 0x1bf   : > { %1709 = vpow2.f32 %v1199_v0  ;;  %v1209_v13 = vmul.f32 1.442695, %v1180_v62  ;;  %v1211_v16 = vmul.f32 1.442695, %v1181_v63  ;;  %v1213_v18 = vmul.f32 1.442695, %v1182_v4 }
 0x1c0   : > { %1711 = vpow2.f32 %v1201_v1  ;;  %v961_v29 = vadd.f32 %v2095_v28, %v795_v17  ;;  %v2181_v30 = vadd.f32 %v1128_v2, %v884_v22  ;;  %v1151_v35 = vand.u32 2147483647, %v2176_v15 }
 0x1c1   : > { %1713 = vpow2.f32 %v1203_v5  ;;  %v1036_v39 = vadd.f32 %v2104_v37, %v796_v21  ;;  %v2185_v50 = vadd.f32 %v1128_v2, %v959_v25  ;;  %v1038_v20 = vadd.f32 %v2107_v38, %v797_v19 }
 0x1c2   : > { %1715 = vpow2.f32 %v1205_v6  ;;  %v2188_v41 = vadd.f32 %v1128_v2, %v961_v29  ;;  %v1113_v27 = vadd.f32 %v2116_v47, %v798_v26  ;;  %v1167_v28 = vsub.f32 0.0, %v1151_v35 }
 0x1c3   : > { %1717 = vpow2.f32 %v1207_v7  ;;  %v2191_v42 = vadd.f32 %v1128_v2, %v1036_v39  ;;  %v1115_v51 = vadd.f32 %v2119_v48, %v799_v36  ;;  %v2194_v52 = vadd.f32 %v1128_v2, %v1038_v20 }
 0x1c4   : > { %1719 = vpow2.f32 %v1209_v13  ;;  %v1152_v53 = vand.u32 2147483647, %v2181_v30  ;;  %v2199_v37 = vadd.f32 %v1128_v2, %v1113_v27  ;;  %v1153_v55 = vand.u32 2147483647, %v2185_v50 }
 0x1c5   : > { %1721 = vpow2.f32 %v1211_v16  ;;  %v1183_v38 = vmul.f32 1.442695, %v1167_v28  ;;  %v2205_v57 = vadd.f32 %v1128_v2, %v1115_v51  ;;  %v1154_v58 = vand.u32 2147483647, %v2188_v41 }
 0x1c6   : > { %1723 = vpow2.f32 %v1213_v18  ;;  %v1155_v60 = vand.u32 2147483647, %v2191_v42  ;;  %v1156_v63 = vand.u32 2147483647, %v2194_v52  ;;  %v1168_v0 = vsub.f32 0.0, %v1152_v53 }
 0x1c7   : > { %1725 = vpow2.f32 %v1183_v38  ;;  %v1157_v3 = vand.u32 2147483647, %v2199_v37  ;;  %v1169_v4 = vsub.f32 0.0, %v1153_v55  ;;  %v1158_v7 = vand.u32 2147483647, %v2205_v57 }
 0x1c8   : > { %v1170_v8 = vsub.f32 0.0, %v1154_v58  ;;  %v1171_v16 = vsub.f32 0.0, %v1155_v60  ;;  %v1172_v21 = vsub.f32 0.0, %v1156_v63  ;;  %v1185_v22 = vmul.f32 1.442695, %v1168_v0 }
 0x1c9   : > { %v2197_v54 = vpop.eup %1709  ;;  %v1173_v25 = vsub.f32 0.0, %v1157_v3  ;;  %v1187_v26 = vmul.f32 1.442695, %v1169_v4  ;;  %v1174_v29 = vsub.f32 0.0, %v1158_v7  ;;  %v325_v36 = vunpack.c.l.bf16 %v1944_v10 }
 0x1ca   : > { %v2202_v56 = vpop.eup %1711  ;;  %v1223_v47 = vadd.f32 1.0, %v2197_v54  ;;  %v1189_v35 = vmul.f32 1.442695, %v1170_v8  ;;  %v326_v39 = vunpack.c.h.bf16 %v1944_v10  ;;  %v1191_v20 = vmul.f32 1.442695, %v1171_v16 }
 0x1cb   : > { %v2208_v48 = vpop.eup %1713  ;;  %v1224_v59 = vadd.f32 1.0, %v2202_v56  ;;  %v327_v27 = vunpack.c.l.bf16 %v1955_v12  ;;  %v328_v28 = vunpack.c.h.bf16 %v1955_v12  ;;  %v1193_v51 = vmul.f32 1.442695, %v1172_v21 }
 0x1cc   : > { %v2212_v61 = vpop.eup %1715  ;;  %v1225_v62 = vadd.f32 1.0, %v2208_v48  ;;  %1727 = vrcp.f32 %v1223_v47  ;;  %v329_v55 = vunpack.c.l.bf16 %v1999_v34  ;;  %v330_v38 = vunpack.c.h.bf16 %v1999_v34 }
 0x1cd   : > { %v2216_v1 = vpop.eup %1717  ;;  %v1226_v2 = vadd.f32 1.0, %v2212_v61  ;;  %1729 = vrcp.f32 %v1224_v59  ;;  %v1195_v47 = vmul.f32 1.442695, %v1173_v25  ;;  %v331_v10 = vunpack.c.l.bf16 %v2025_v45 }
 0x1ce   : > { %v2220_v5 = vpop.eup %1719  ;;  %v1227_v6 = vadd.f32 1.0, %v2216_v1  ;;  %1731 = vrcp.f32 %v1225_v62  ;;  %v332_v59 = vunpack.c.h.bf16 %v2025_v45  ;;  %v1197_v12 = vmul.f32 1.442695, %v1174_v29 }
 0x1cf   : > { %v2224_v13 = vpop.eup %1721  ;;  %v1228_v14 = vadd.f32 1.0, %v2220_v5  ;;  %1733 = vrcp.f32 %v1226_v2  ;;  %vm1255_vm5 = vcmp.ge.f32.partialorder %v2151_v40, 0.0  ;;  %vm1256_vm6 = vcmp.ge.f32.partialorder %v2153_v43, 0.0 }
 0x1d0   : > { %v2227_v17 = vpop.eup %1723  ;;  %v1229_v18 = vadd.f32 1.0, %v2224_v13  ;;  %1735 = vrcp.f32 %v1227_v6  ;;  %vm1257_vm7 = vcmp.ge.f32.partialorder %v2155_v46, 0.0  ;;  %vm1258_vm8 = vcmp.ge.f32.partialorder %v2157_v23, 0.0 }
 0x1d1   : > { %v1230_v19 = vadd.f32 1.0, %v2227_v17  ;;  %1737 = vrcp.f32 %v1228_v14  ;;  %v2235_v53 = vpop.eup %1725  ;;  %vm1259_vm9 = vcmp.ge.f32.partialorder %v2159_v24, 0.0  ;;  %vm1260_vm10 = vcmp.ge.f32.partialorder %v2161_v31, 0.0 }
 0x1d2   : > { %1739 = vrcp.f32 %v1229_v18  ;;  %v1215_v34 = vadd.f32 1.0, %v2235_v53  ;;  %vm1261_vm11 = vcmp.ge.f32.partialorder %v2163_v32, 0.0  ;;  %vm1262_vm12 = vcmp.ge.f32.partialorder %v2165_v49, 0.0 }
 0x1d3   : > { %1741 = vrcp.f32 %v1230_v19  ;;  %vm1247_vm13 = vcmp.ge.f32.partialorder %v2176_v15, 0.0  ;;  %vm1248_vm14 = vcmp.ge.f32.partialorder %v2181_v30, 0.0  ;;  %vm1249_vm15 = vcmp.ge.f32.partialorder %v2185_v50, 0.0 }
 0x1d4   : > { %1743 = vpow2.f32 %v1185_v22  ;;  %vm1250_vm0 = vcmp.ge.f32.partialorder %v2188_v41, 0.0  ;;  %vm1251_vm1 = vcmp.ge.f32.partialorder %v2191_v42, 0.0  ;;  %vm1252_vm2 = vcmp.ge.f32.partialorder %v2194_v52, 0.0 }
 0x1d5   : > { %1745 = vpow2.f32 %v1187_v26  ;;  %vm1253_vm3 = vcmp.ge.f32.partialorder %v2199_v37, 0.0  ;;  %vm1254_vm4 = vcmp.ge.f32.partialorder %v2205_v57, 0.0 }
 0x1d6   : > { %v1728_v58 = vpop.eup %1727  ;;  %1747 = vpow2.f32 %v1189_v35 }
 0x1d7   : > { %v1730_v60 = vpop.eup %1729  ;;  %v1271_v62 = vmul.f32 %v1728_v58, %v2197_v54  ;;  %1749 = vpow2.f32 %v1191_v20 }
 0x1d8   : > { %v1732_v63 = vpop.eup %1731  ;;  %v1272_v0 = vmul.f32 %v1730_v60, %v2202_v56  ;;  %1751 = vpow2.f32 %v1193_v51 }
 0x1d9   : > { %v1734_v2 = vpop.eup %1733  ;;  %v1273_v45 = vmul.f32 %v1732_v63, %v2208_v48  ;;  %v1287_v3 = vsel %vm1255_vm5, %v1728_v58, %v1271_v62  ;;  %1753 = vpow2.f32 %v1195_v47  ;;  %v317_v47 = vunpack.c.l.bf16 %v1941_v9 }
 0x1da   : > { %v1736_v40 = vpop.eup %1735  ;;  %v1274_v54 = vmul.f32 %v1734_v2, %v2212_v61  ;;  %v1288_v4 = vsel %vm1256_vm6, %v1730_v60, %v1272_v0  ;;  %v1303_v6 = vmul.f32 %v1287_v3, %v325_v36  ;;  %1755 = vpow2.f32 %v1197_v12 }
 0x1db   : > { %v1738_v43 = vpop.eup %1737  ;;  %v1275_v46 = vmul.f32 %v1736_v40, %v2216_v1  ;;  %v1289_v7 = vsel %vm1257_vm7, %v1732_v63, %v1273_v45  ;;  %v1304_v56 = vmul.f32 %v1288_v4, %v326_v39  ;;  %1757 = vrcp.f32 %v1215_v34 }
 0x1dc   : > { %v1740_v8 = vpop.eup %1739  ;;  %v1276_v48 = vmul.f32 %v1738_v43, %v2220_v5  ;;  %v1290_v14 = vsel %vm1258_vm8, %v1734_v2, %v1274_v54  ;;  %v1305_v16 = vmul.f32 %v1289_v7, %v327_v27  ;;  %1319 = vst [vmem:[%s2260_s18 + $0x40] sm:$0xff] %v1303_v6  ;;  %v318_v62 = vunpack.c.h.bf16 %v1941_v9 }
 0x1dd   : > { %v1742_v61 = vpop.eup %1741  ;;  %v1277_v1 = vmul.f32 %v1740_v8, %v2224_v13  ;;  %v1291_v18 = vsel %vm1259_vm9, %v1736_v40, %v1275_v46  ;;  %v1306_v24 = vmul.f32 %v1290_v14, %v328_v28  ;;  %1320 = vst [vmem:[%s2260_s18 + $0x48] sm:$0xff] %v1304_v56  ;;  %v319_v63 = vunpack.c.l.bf16 %v1952_v11 }
 0x1de   : > { %v1744_v5 = vpop.eup %1743  ;;  %v1278_v23 = vmul.f32 %v1742_v61, %v2227_v17  ;;  %v1292_v21 = vsel %vm1260_vm10, %v1738_v43, %v1276_v48  ;;  %v1307_v22 = vmul.f32 %v1291_v18, %v329_v55  ;;  %1321 = vst [vmem:[%s2260_s18 + $0x50] sm:$0xff] %v1305_v16  ;;  %v320_v0 = vunpack.c.h.bf16 %v1952_v11 }
 0x1df   : > { %v1746_v19 = vpop.eup %1745  ;;  %v1293_v31 = vsel %vm1261_vm11, %v1740_v8, %v1277_v1  ;;  %v1308_v25 = vmul.f32 %v1292_v21, %v330_v38  ;;  %1322 = vst [vmem:[%s2260_s18 + $0x58] sm:$0xff] %v1306_v24  ;;  %v1216_v13 = vadd.f32 1.0, %v1744_v5  ;;  %v321_v2 = vunpack.c.l.bf16 %v1996_v33 }
 0x1e0   : > { %v1748_v26 = vpop.eup %1747  ;;  %v1294_v29 = vsel %vm1262_vm12, %v1742_v61, %v1278_v23  ;;  %v1309_v35 = vmul.f32 %v1293_v31, %v331_v10  ;;  %1323 = vst [vmem:[%s2260_s18 + $0x60] sm:$0xff] %v1307_v22  ;;  %v1217_v32 = vadd.f32 1.0, %v1746_v19  ;;  %v323_v40 = vunpack.c.l.bf16 %v2022_v44 }
 0x1e1   : > { %v1750_v36 = vpop.eup %1749  ;;  %v1310_v17 = vmul.f32 %v1294_v29, %v332_v59  ;;  %1324 = vst [vmem:[%s2260_s18 + $0x68] sm:$0xff] %v1308_v25  ;;  %v1218_v39 = vadd.f32 1.0, %v1748_v26  ;;  %1759 = vrcp.f32 %v1216_v13  ;;  %v324_v9 = vunpack.c.h.bf16 %v2022_v44 }
 0x1e2   : > { %v1752_v20 = vpop.eup %1751  ;;  %1325 = vst [vmem:[%s2260_s18 + $0x70] sm:$0xff] %v1309_v35  ;;  %v1219_v27 = vadd.f32 1.0, %v1750_v36  ;;  %1761 = vrcp.f32 %v1217_v32 }
 0x1e3   : > { %v1754_v49 = vpop.eup %1753  ;;  %1326 = vst [vmem:[%s2260_s18 + $0x78] sm:$0xff] %v1310_v17  ;;  %v1220_v28 = vadd.f32 1.0, %v1752_v20  ;;  %1763 = vrcp.f32 %v1218_v39  ;;  %v1367_v25 = vld [vmem:[%s2260_s18 + $0x40] sm:$0xff] (%p1910_p6) }
 0x1e4   : > { %v1756_v51 = vpop.eup %1755  ;;  %v1221_v55 = vadd.f32 1.0, %v1754_v49  ;;  %1765 = vrcp.f32 %v1219_v27  ;;  %v1369_v13 = vld [vmem:[%s2260_s18 + $0x48] sm:$0xff] (%p1910_p6)  ;;  %1368 = vst [vmem:[%s1338_s28 + $0x100] sm:$0xff] (%p1910_p6), %v1367_v25 }
 0x1e5   : > { %v1758_v38 = vpop.eup %1757  ;;  %v1222_v58 = vadd.f32 1.0, %v1756_v51  ;;  %1767 = vrcp.f32 %v1220_v28  ;;  %1370 = vst [vmem:[%s1338_s28 + $0x108] sm:$0xff] (%p1910_p6), %v1369_v13 }
 0x1e6   : > { %1769 = vrcp.f32 %v1221_v55  ;;  %v1263_v10 = vmul.f32 %v1758_v38, %v2235_v53  ;;  %v322_v53 = vunpack.c.h.bf16 %v1996_v33  ;;  %v1373_v29 = vld [vmem:[%s2260_s18 + $0x58] sm:$0xff] (%p1910_p6) }
 0x1e7   : > { %1771 = vrcp.f32 %v1222_v58  ;;  %1374 = vst [vmem:[%s1338_s28 + $0x118] sm:$0xff] (%p1910_p6), %v1373_v29  ;;  %v1375_v35 = vld [vmem:[%s2260_s18 + $0x60] sm:$0xff] (%p1910_p6) }
 0x1e8   : > { %v1279_v59 = vsel %vm1247_vm13, %v1758_v38, %v1263_v10  ;;  %v1377_v32 = vld [vmem:[%s2260_s18 + $0x68] sm:$0xff] (%p1910_p6)  ;;  %1376 = vst [vmem:[%s1338_s28 + $0x120] sm:$0xff] (%p1910_p6), %v1375_v35 }
 0x1e9   : > { %v1295_v12 = vmul.f32 %v1279_v59, %v317_v47  ;;  %1378 = vst [vmem:[%s1338_s28 + $0x128] sm:$0xff] (%p1910_p6), %v1377_v32 }
 0x1ea   : > { %v1381_v17 = vld [vmem:[%s2260_s18 + $0x78] sm:$0xff] (%p1910_p6) }
 0x1eb   : > { %v1760_v60 = vpop.eup %1759  ;;  %1311 = vst [vmem:[%s2260_s18] sm:$0xff] %v1295_v12  ;;  %1382 = vst [vmem:[%s1338_s28 + $0x138] sm:$0xff] (%p1910_p6), %v1381_v17 }
 0x1ec   : > { %v1762_v34 = vpop.eup %1761  ;;  %v1264_v45 = vmul.f32 %v1760_v60, %v1744_v5 }
 0x1ed   : > { %v1764_v3 = vpop.eup %1763  ;;  %v1265_v15 = vmul.f32 %v1762_v34, %v1746_v19 }
 0x1ee   : > { %v1766_v54 = vpop.eup %1765  ;;  %v1266_v4 = vmul.f32 %v1764_v3, %v1748_v26  ;;  %v1280_v6 = vsel %vm1248_vm14, %v1760_v60, %v1264_v45  ;;  %v1371_v26 = vld [vmem:[%s2260_s18 + $0x50] sm:$0xff] (%p1910_p6) }
 0x1ef   : > { %v1768_v11 = vpop.eup %1767  ;;  %v1267_v43 = vmul.f32 %v1766_v54, %v1750_v36  ;;  %v1281_v46 = vsel %vm1249_vm15, %v1762_v34, %v1265_v15  ;;  %v1296_v7 = vmul.f32 %v1280_v6, %v318_v62  ;;  %1372 = vst [vmem:[%s1338_s28 + $0x110] sm:$0xff] (%p1910_p6), %v1371_v26  ;;  %v1379_v36 = vld [vmem:[%s2260_s18 + $0x70] sm:$0xff] (%p1910_p6) }
 0x1f0   : > { %v1770_v33 = vpop.eup %1769  ;;  %v1268_v30 = vmul.f32 %v1768_v11, %v1752_v20  ;;  %v1282_v56 = vsel %vm1250_vm0, %v1764_v3, %v1266_v4  ;;  %v1297_v8 = vmul.f32 %v1281_v46, %v319_v63  ;;  %1380 = vst [vmem:[%s1338_s28 + $0x130] sm:$0xff] (%p1910_p6), %v1379_v36 }
 0x1f1   : > { %v1772_v44 = vpop.eup %1771  ;;  %v1269_v50 = vmul.f32 %v1770_v33, %v1754_v49  ;;  %v1283_v48 = vsel %vm1251_vm1, %v1766_v54, %v1267_v43  ;;  %v1298_v14 = vmul.f32 %v1282_v56, %v320_v0  ;;  %1312 = vst [vmem:[%s2260_s18 + $0x8] sm:$0xff] %v1296_v7  ;;  %1333 = sbr.rel (!%p1910_p6) target bundleno = 512 (0x200), region = 67 }
 0x1f2   : > { %v1270_v41 = vmul.f32 %v1772_v44, %v1756_v51  ;;  %v1284_v16 = vsel %vm1252_vm2, %v1768_v11, %v1268_v30  ;;  %v1299_v42 = vmul.f32 %v1283_v48, %v321_v2  ;;  %1313 = vst [vmem:[%s2260_s18 + $0x10] sm:$0xff] %v1297_v8  ;;  %v1351_v37 = vld [vmem:[%s2260_s18] sm:$0xff] (%p1910_p6) }
 0x1f3   : > { %v1285_v61 = vsel %vm1253_vm3, %v1770_v33, %v1269_v50  ;;  %v1300_v1 = vmul.f32 %v1284_v16, %v322_v53  ;;  %1314 = vst [vmem:[%s2260_s18 + $0x18] sm:$0xff] %v1298_v14  ;;  %1352 = vst [vmem:[%s1338_s28] sm:$0xff] (%p1910_p6), %v1351_v37 }
 0x1f4   : > { %v1286_v52 = vsel %vm1254_vm4, %v1772_v44, %v1270_v41  ;;  %v1301_v18 = vmul.f32 %v1285_v61, %v323_v40  ;;  %1315 = vst [vmem:[%s2260_s18 + $0x20] sm:$0xff] %v1299_v42 }
 0x1f5   : > { %v1302_v24 = vmul.f32 %v1286_v52, %v324_v9  ;;  %1316 = vst [vmem:[%s2260_s18 + $0x28] sm:$0xff] %v1300_v1 }
 0x1f6   : > { %1317 = vst [vmem:[%s2260_s18 + $0x30] sm:$0xff] %v1301_v18 }
 0x1f7   : > { %1318 = vst [vmem:[%s2260_s18 + $0x38] sm:$0xff] %v1302_v24 }
 0x1f8   : > { %v1353_v57 = vld [vmem:[%s2260_s18 + $0x8] sm:$0xff] }
 0x1f9   : > { %v1355_v5 = vld [vmem:[%s2260_s18 + $0x10] sm:$0xff]  ;;  %1354 = vst [vmem:[%s1338_s28 + $0x8] sm:$0xff] %v1353_v57 }
 0x1fa   : > { %v1357_v23 = vld [vmem:[%s2260_s18 + $0x18] sm:$0xff]  ;;  %1356 = vst [vmem:[%s1338_s28 + $0x10] sm:$0xff] %v1355_v5 }
 0x1fb   : > { %v1359_v21 = vld [vmem:[%s2260_s18 + $0x20] sm:$0xff]  ;;  %1358 = vst [vmem:[%s1338_s28 + $0x18] sm:$0xff] %v1357_v23 }
 0x1fc   : > { %v1361_v22 = vld [vmem:[%s2260_s18 + $0x28] sm:$0xff]  ;;  %1360 = vst [vmem:[%s1338_s28 + $0x20] sm:$0xff] %v1359_v21 }
 0x1fd   : > { %v1363_v19 = vld [vmem:[%s2260_s18 + $0x30] sm:$0xff]  ;;  %1362 = vst [vmem:[%s1338_s28 + $0x28] sm:$0xff] %v1361_v22 }
 0x1fe   : > { %v1365_v31 = vld [vmem:[%s2260_s18 + $0x38] sm:$0xff]  ;;  %1364 = vst [vmem:[%s1338_s28 + $0x30] sm:$0xff] %v1363_v19 }
 0x1ff   : > { %1366 = vst [vmem:[%s1338_s28 + $0x38] sm:$0xff] %v1365_v31 }
 0x200 PF: > { %s15_s24 = sadd.s32 1, %s1827_s24   ;;  %s2351_s18 = smov %s1807_s19 }
 0x201   : > { %p12_p0 = scmp.ge.s32.totalorder %s15_s24, 10   ;;  %s2352_s19 = smov %s1918_s8 }
 0x202   : > { %s2353_s20 = smov %s1819_s22  ;;  %s2354_s21 = smov %s1823_s23 }
 0x203   : > { %s2355_s22 = smov %s2358_s25  ;;  %s2356_s23 = smov %s2362_s26 }
 0x204   :  { %14 = sbr.rel (!%p12_p0) target bundleno = 4 (0x4), region = 124 }

</bundles_post_ra>
